<compile_context>
chip_gen: v6e
topology: v6e:2x2x1
jax: 0.10.0
libtpu: 0.0.40
codegen_flags: <defaults>
</compile_context>

<pallas_src>
import functools

import jax
import jax.numpy as jnp
from jax.experimental import pallas as pl
from jax.experimental.pallas import tpu as pltpu


def _channel_attention_kernel(x_ref, wd_ref, wu_ref, o_ref, *, nb, hw_valid, hw_pad):
    """x_ref/o_ref: (Nb, C, HWp).  wd_ref: (Cm, C).  wu_ref: (C, Cm)."""
    f32 = jnp.float32
    c = x_ref.shape[1]

    # Lane-validity mask (only materialized when the spatial dim was padded).
    valid = None
    if hw_pad != hw_valid:
        lane = jax.lax.broadcasted_iota(jnp.int32, (c, hw_pad), 1)
        valid = lane < hw_valid
    inv_hw = 1.0 / float(hw_valid)

    # ---- global avg / max pool over the spatial (lane) dim for all Nb images ----
    avg_cols = []
    max_cols = []
    for i in range(nb):                                   # static unroll, Nb small
        xi = x_ref[i].astype(f32)                         # (C, HWp)
        avg_cols.append(jnp.sum(xi, axis=-1, keepdims=True) * inv_hw)   # (C, 1)
        xm = xi if valid is None else jnp.where(valid, xi, -jnp.inf)
        max_cols.append(jnp.max(xm, axis=-1, keepdims=True))            # (C, 1)

    # (C, 2*Nb): C on sublanes, 2*Nb pooled columns along lanes -> the shared FC
    # runs as exactly two matmuls per grid step (not two per image).
    pooled = jnp.concatenate(avg_cols + max_cols, axis=1)               # (C, 2Nb)

    # ---- shared FC: 1x1 conv C->Cm, ReLU, 1x1 conv Cm->C (no bias) ----
    h = jnp.maximum(
        jnp.dot(wd_ref[...], pooled, preferred_element_type=f32), 0.0)  # (Cm, 2Nb)
    y = jnp.dot(wu_ref[...], h, preferred_element_type=f32)             # (C, 2Nb)

    # ---- sigmoid(avg_out + max_out), broadcast over lanes, scale ----
    att = jax.nn.sigmoid(y[:, :nb] + y[:, nb:])                          # (C, Nb)
    for i in range(nb):
        xi = x_ref[i].astype(f32)                                        # (C, HWp)
        o_ref[i] = (xi * att[:, i:i + 1]).astype(o_ref.dtype)


def channel_attention_pallas(x_nchw, wd, wu, *, grid_blocks=None):
    """CBAM channel attention.

    x_nchw: (N, C, H, W) float32.
    wd: (Cm, C)  == Conv2d(C, Cm, 1, bias=False).weight.squeeze()
    wu: (C, Cm)  == Conv2d(Cm, C, 1, bias=False).weight.squeeze()
    grid_blocks: number of grid steps; each handles N // grid_blocks images.
      Default: 2 when N is even (keeps both v7x TensorCores busy while paying
      only one extra ~0.35 us step on v5e/v6e); pass 1 on single-TC chips to
      collapse the kernel to a single step.
    """
    N, C, H, W = x_nchw.shape
    Cm = wd.shape[0]
    HW = H * W
    HWp = ((HW + 127) // 128) * 128            # keep the lane dim 128-dense

    if grid_blocks is None:
        grid_blocks = 2 if (N % 2 == 0 and N >= 2) else 1
    assert N % grid_blocks == 0, (N, grid_blocks)
    Nb = N // grid_blocks

    x = x_nchw.reshape(N, C, HW)               # free: NCHW is already row-major
    if HWp != HW:
        x = jnp.pad(x, ((0, 0), (0, 0), (0, HWp - HW)))

    kernel = functools.partial(
        _channel_attention_kernel, nb=Nb, hw_valid=HW, hw_pad=HWp)

    cost = pl.CostEstimate(
        flops=int(N * (3 * C * HW + 8 * C * Cm)),
        transcendentals=int(N * C),
        bytes_accessed=int(2 * N * C * HWp * 4 + 2 * C * Cm * 4),
    )

    out = pl.pallas_call(
        kernel,
        out_shape=jax.ShapeDtypeStruct((N, C, HWp), x.dtype),
        grid_spec=pltpu.PrefetchScalarGridSpec(
            num_scalar_prefetch=0,
            grid=(grid_blocks,),
            in_specs=[
                pl.BlockSpec((Nb, C, HWp), lambda b: (b, 0, 0)),
                # Constant block index -> weights stay VMEM-resident across steps.
                pl.BlockSpec((Cm, C), lambda b: (0, 0)),
                pl.BlockSpec((C, Cm), lambda b: (0, 0)),
            ],
            out_specs=pl.BlockSpec((Nb, C, HWp), lambda b: (b, 0, 0)),
        ),
        compiler_params=pltpu.CompilerParams(
            dimension_semantics=("parallel",)),
        input_output_aliases={0: 0},           # scaled x may be written in place
        cost_estimate=cost,
    )(x, wd, wu)

    if HWp != HW:
        out = out[:, :, :HW]
    return out.reshape(N, C, H, W)


# ---------------- pure-JAX reference (for correctness check) ----------------
def channel_attention_ref(x_nchw, wd, wu):
    avg = jnp.mean(x_nchw, axis=(2, 3))                       # (N, C)
    mx = jnp.max(x_nchw, axis=(2, 3))                         # (N, C)

    def fc(v):                                                # v: (N, C)
        h = jnp.maximum(jnp.einsum("nc,mc->nm", v, wd), 0.0)  # (N, Cm)
        return jnp.einsum("nm,cm->nc", h, wu)                 # (N, C)

    att = jax.nn.sigmoid(fc(avg) + fc(mx))                    # (N, C)
    return x_nchw * att[:, :, None, None]


if __name__ == "__main__":
    # ChannelAttention(channels=32, reduction=16) -> Cm = 2; batch of 4 images
    # so the default grid=(2,) processes Nb=2 images per (parallel) step.
    N, C, Hs, Ws = 4, 32, 16, 16
    RED = 16
    Cm = C // RED

    key = jax.random.PRNGKey(0)
    k = iter(jax.random.split(key, 4))

    x_nchw = jax.random.normal(next(k), (N, C, Hs, Ws), jnp.float32)
    # PyTorch Conv2d weights, kernel size 1, bias=False (squeezed to 2-D).
    wd = jax.random.normal(next(k), (Cm, C), jnp.float32) * (1.0 / C ** 0.5)
    wu = jax.random.normal(next(k), (C, Cm), jnp.float32) * (1.0 / max(Cm, 1) ** 0.5)

    # Reference first: x may be aliased/donated into the kernel output.
    ref = channel_attention_ref(x_nchw, wd, wu)

    out = channel_attention_pallas(x_nchw, wd, wu)
    out = jax.block_until_ready(out)

    assert out.shape == (N, C, Hs, Ws)
    assert jnp.allclose(out, ref, atol=1e-4, rtol=1e-4), (
        float(jnp.max(jnp.abs(out - ref))))

    print("KERNEL_OK")
</pallas_src>

<mosaic_0001>
module attributes {stable_mosaic.version = 11 : i64} {
  func.func @_channel_attention_kernel(%arg0: i32, %arg1: memref<2x32x256xf32, #tpu.memory_space<vmem>>, %arg2: memref<2x32xf32, #tpu.memory_space<vmem>>, %arg3: memref<32x2xf32, #tpu.memory_space<vmem>>, %arg4: memref<2x32x256xf32, #tpu.memory_space<vmem>>) attributes {dimension_semantics = [#tpu.dimension_semantics<parallel>], iteration_bounds = array<i64: 2>, scalar_prefetch = 0 : i64, scratch_operands = 0 : i64, tpu.core_type = #tpu.core_type<tc>, window_params = [{transform_indices = @transform_0, window_bounds = array<i64: 2, 32, 256>}, {pipeline_mode = #tpu.pipeline_mode<synchronous>, transform_indices = @transform_1, window_bounds = array<i64: 2, 32>}, {pipeline_mode = #tpu.pipeline_mode<synchronous>, transform_indices = @transform_2, window_bounds = array<i64: 32, 2>}, {transform_indices = @transform_3, window_bounds = array<i64: 2, 32, 256>}]} {
    %c0 = arith.constant 0 : index
    %c0_0 = arith.constant 0 : index
    %c0_1 = arith.constant 0 : index
    %0 = vector.load %arg1[%c0, %c0_0, %c0_1] : memref<2x32x256xf32, #tpu.memory_space<vmem>>, vector<1x32x256xf32>
    %1 = vector.shape_cast %0 : vector<1x32x256xf32> to vector<32x256xf32>
    %cst = arith.constant dense<0.000000e+00> : vector<32xf32>
    %2 = vector.multi_reduction <add>, %1, %cst [1] : vector<32x256xf32> to vector<32xf32>
    %3 = vector.shape_cast %2 : vector<32xf32> to vector<32x1xf32>
    %cst_2 = arith.constant 3.906250e-03 : f32
    %4 = vector.broadcast %cst_2 : f32 to vector<32x1xf32>
    %5 = arith.mulf %3, %4 : vector<32x1xf32>
    %cst_3 = arith.constant dense<0xFF800000> : vector<32xf32>
    %6 = vector.multi_reduction <maximumf>, %1, %cst_3 [1] : vector<32x256xf32> to vector<32xf32>
    %7 = vector.shape_cast %6 : vector<32xf32> to vector<32x1xf32>
    %c1 = arith.constant 1 : index
    %c0_4 = arith.constant 0 : index
    %c0_5 = arith.constant 0 : index
    %8 = vector.load %arg1[%c1, %c0_4, %c0_5] : memref<2x32x256xf32, #tpu.memory_space<vmem>>, vector<1x32x256xf32>
    %9 = vector.shape_cast %8 : vector<1x32x256xf32> to vector<32x256xf32>
    %cst_6 = arith.constant dense<0.000000e+00> : vector<32xf32>
    %10 = vector.multi_reduction <add>, %9, %cst_6 [1] : vector<32x256xf32> to vector<32xf32>
    %11 = vector.shape_cast %10 : vector<32xf32> to vector<32x1xf32>
    %cst_7 = arith.constant 3.906250e-03 : f32
    %12 = vector.broadcast %cst_7 : f32 to vector<32x1xf32>
    %13 = arith.mulf %11, %12 : vector<32x1xf32>
    %cst_8 = arith.constant dense<0xFF800000> : vector<32xf32>
    %14 = vector.multi_reduction <maximumf>, %9, %cst_8 [1] : vector<32x256xf32> to vector<32xf32>
    %15 = vector.shape_cast %14 : vector<32xf32> to vector<32x1xf32>
    %16 = tpu.concatenate %5, %13, %7, %15 in 1 : vector<32x1xf32>, vector<32x1xf32>, vector<32x1xf32>, vector<32x1xf32> -> vector<32x4xf32>
    %c0_9 = arith.constant 0 : index
    %c0_10 = arith.constant 0 : index
    %17 = vector.load %arg2[%c0_9, %c0_10] : memref<2x32xf32, #tpu.memory_space<vmem>>, vector<2x32xf32>
    %cst_11 = arith.constant dense<0.000000e+00> : vector<2x4xf32>
    %18 = tpu.matmul %17, %16, %cst_11 {dimension_numbers = #tpu.dot_dimension_numbers<[1], [0], [0], [1], [0, 0, 1, 1], [], []>} : vector<2x32xf32>, vector<32x4xf32>, vector<2x4xf32> -> vector<2x4xf32>
    %cst_12 = arith.constant 0.000000e+00 : f32
    %19 = vector.broadcast %cst_12 : f32 to vector<2x4xf32>
    %20 = arith.maximumf %18, %19 : vector<2x4xf32>
    %c0_13 = arith.constant 0 : index
    %c0_14 = arith.constant 0 : index
    %21 = vector.load %arg3[%c0_13, %c0_14] : memref<32x2xf32, #tpu.memory_space<vmem>>, vector<32x2xf32>
    %cst_15 = arith.constant dense<0.000000e+00> : vector<32x4xf32>
    %22 = tpu.matmul %21, %20, %cst_15 {dimension_numbers = #tpu.dot_dimension_numbers<[1], [0], [0], [1], [0, 0, 1, 1], [], []>} : vector<32x2xf32>, vector<2x4xf32>, vector<32x4xf32> -> vector<32x4xf32>
    %23 = vector.extract_strided_slice %22 {offsets = [0, 0], sizes = [32, 2], strides = [1, 1]} : vector<32x4xf32> to vector<32x2xf32>
    %24 = vector.extract_strided_slice %22 {offsets = [0, 2], sizes = [32, 2], strides = [1, 1]} : vector<32x4xf32> to vector<32x2xf32>
    %25 = arith.addf %23, %24 : vector<32x2xf32>
    %26 = arith.negf %25 : vector<32x2xf32>
    %27 = math.exp %26 : vector<32x2xf32>
    %cst_16 = arith.constant 1.000000e+00 : f32
    %28 = vector.broadcast %cst_16 : f32 to vector<32x2xf32>
    %29 = arith.addf %28, %27 : vector<32x2xf32>
    %30 = arith.divf %28, %29 : vector<32x2xf32>
    %c0_17 = arith.constant 0 : index
    %c0_18 = arith.constant 0 : index
    %c0_19 = arith.constant 0 : index
    %31 = vector.load %arg1[%c0_17, %c0_18, %c0_19] : memref<2x32x256xf32, #tpu.memory_space<vmem>>, vector<1x32x256xf32>
    %32 = vector.shape_cast %31 : vector<1x32x256xf32> to vector<32x256xf32>
    %33 = vector.extract_strided_slice %30 {offsets = [0, 0], sizes = [32, 1], strides = [1, 1]} : vector<32x2xf32> to vector<32x1xf32>
    %34 = vector.broadcast %33 : vector<32x1xf32> to vector<32x256xf32>
    %35 = arith.mulf %32, %34 : vector<32x256xf32>
    %c0_20 = arith.constant 0 : index
    %c0_21 = arith.constant 0 : index
    %c0_22 = arith.constant 0 : index
    %36 = vector.load %arg4[%c0_20, %c0_21, %c0_22] : memref<2x32x256xf32, #tpu.memory_space<vmem>>, vector<1x32x256xf32>
    %37 = vector.shape_cast %36 : vector<1x32x256xf32> to vector<32x256xf32>
    %38 = vector.shape_cast %35 : vector<32x256xf32> to vector<1x32x256xf32>
    tpu.vector_store %arg4[%c0_20, %c0_21, %c0_22], %38 {strides = array<i32>} : memref<2x32x256xf32, #tpu.memory_space<vmem>>, vector<1x32x256xf32>,
    %c1_23 = arith.constant 1 : index
    %c0_24 = arith.constant 0 : index
    %c0_25 = arith.constant 0 : index
    %39 = vector.load %arg1[%c1_23, %c0_24, %c0_25] : memref<2x32x256xf32, #tpu.memory_space<vmem>>, vector<1x32x256xf32>
    %40 = vector.shape_cast %39 : vector<1x32x256xf32> to vector<32x256xf32>
    %41 = vector.extract_strided_slice %30 {offsets = [0, 1], sizes = [32, 1], strides = [1, 1]} : vector<32x2xf32> to vector<32x1xf32>
    %42 = vector.broadcast %41 : vector<32x1xf32> to vector<32x256xf32>
    %43 = arith.mulf %40, %42 : vector<32x256xf32>
    %c1_26 = arith.constant 1 : index
    %c0_27 = arith.constant 0 : index
    %c0_28 = arith.constant 0 : index
    %44 = vector.load %arg4[%c1_26, %c0_27, %c0_28] : memref<2x32x256xf32, #tpu.memory_space<vmem>>, vector<1x32x256xf32>
    %45 = vector.shape_cast %44 : vector<1x32x256xf32> to vector<32x256xf32>
    %46 = vector.shape_cast %43 : vector<32x256xf32> to vector<1x32x256xf32>
    tpu.vector_store %arg4[%c1_26, %c0_27, %c0_28], %46 {strides = array<i32>} : memref<2x32x256xf32, #tpu.memory_space<vmem>>, vector<1x32x256xf32>,
    return
  }
  func.func @transform_0(%arg0: i32) -> (i32, i32, i32) {
    %c0_i32 = arith.constant 0 : i32
    %c0_i32_0 = arith.constant 0 : i32
    %c0_i32_1 = arith.constant 0 : i32
    return %arg0, %c0_i32, %c0_i32_0 : i32, i32, i32
  }
  func.func @transform_1(%arg0: i32) -> (i32, i32) {
    %c0_i32 = arith.constant 0 : i32
    %c0_i32_0 = arith.constant 0 : i32
    %c0_i32_1 = arith.constant 0 : i32
    return %c0_i32, %c0_i32_0 : i32, i32
  }
  func.func @transform_2(%arg0: i32) -> (i32, i32) {
    %c0_i32 = arith.constant 0 : i32
    %c0_i32_0 = arith.constant 0 : i32
    %c0_i32_1 = arith.constant 0 : i32
    return %c0_i32, %c0_i32_0 : i32, i32
  }
  func.func @transform_3(%arg0: i32) -> (i32, i32, i32) {
    %c0_i32 = arith.constant 0 : i32
    %c0_i32_0 = arith.constant 0 : i32
    %c0_i32_1 = arith.constant 0 : i32
    return %arg0, %c0_i32, %c0_i32_0 : i32, i32, i32
  }
}

</mosaic_0001>

<bundles_post_ra>
// kernel: tpu_custom_call.1
= control target key start
LH: loop header
LB: loop body
LE: loop exit
PB: predicated region body
PF: predicated region fallthrough
CT: control target
= control target key end

     0   :  { %8 = vsyncpa [#allocation3], 0  ;;  %s1261_s0 = inlined_call_operand.hbm [shape: f32[4,32,256], index: 0, kind: input, shape index: {}, may-alias: {0,3}]   ;;  %s1262_s1 = inlined_call_operand.vmem [shape: f32[2,32], index: 1, kind: input, shape index: {}]   ;;  %s1263_s2 = inlined_call_operand.vmem [shape: f32[32,2], index: 2, kind: input, shape index: {}]   ;;  %s1264_s3 = inlined_call_operand.hbm [shape: f32[4,32,256], index: 3, kind: output, shape index: {}, may-alias: {0,3}]  }
   0x1   :  { %10 = vsyncpa [#allocation3 + $0x1], 0 }
   0x2   :  { %11 = vsyncpa [#allocation4], 0 }
   0x3   :  { %13 = vsyncpa [#allocation4 + $0x1], 0  ;;  %s955_s12 = smov 0   ;;  %s957_s13 = smov 0  }
   0x4   :  { %s959_s14 = smov 0   ;;  %s961_s15 = smov 0  }
   0x5 LB: > { %s976_s16 = sadd.s32 4294967295, %s922_s15   ;;  %s670_s17 = sadd.s32 4294967294, %s922_s15   ;;  %s922_s15 = sphi %s961_s15, %s1279_s15   ;;  %s918_s14 = sphi %s959_s14, %s1278_s14   ;;  %s914_s13 = sphi %s957_s13, %s1277_s13   ;;  %s910_s12 = sphi %s955_s12, %s1276_s12  }
   0x6   : > { %s980_s18 = sadd.s32 1, %s922_s15   ;;  %s26_s19 = sadd.s32 1, %s918_s14 }
   0x7   : > { %s23_s20 = ssub.s32 %s922_s15, %s980_s18  ;;  %p33_p0 = scmp.ne.s32.totalorder %s918_s14, %s914_s13 }
   0x8   : > { %p24_p1 = scmp.eq.s32.totalorder %s23_s20, 0  ;;  %p34_p2 = scmp.eq.s32.totalorder %s922_s15, 0 }
   0x9   : > { %p39_p3 = scmp.ne.s32.totalorder %s914_s13, %s910_s12  ;;  %p40_p4 = scmp.eq.s32.totalorder %s976_s16, 0 }
   0xa   : > { %s992_s21 = scalar_select %p24_p1, %s918_s14, %s26_s19  }
   0xb   : > { %p994_p5 = por %p34_p2, %p33_p0  ;;  %p998_p6 = por %p40_p4, %p39_p3 }
   0xc   : > { %p105_p7 = scmp.eq.s32.totalorder %s976_s16, 1  ;;  %p111_p8 = scmp.eq.s32.totalorder %s670_s17, 1 }
   0xd   : > { %s1268_s23 = scalar_select %p998_p6, 1, 0 }
   0xe   : > { %p765_p10 = scmp.lt.s32.totalorder %s922_s15, 2  ;;  %p1005_p11 = por %p105_p7, %p33_p0 }
   0xf   : > { %p1009_p12 = por %p111_p8, %p39_p3  ;;  %s137_s26 = sand.u32 1, %s918_s14  }
  0x10   : > { %s1269_s24 = scalar_select %p1005_p11, 1, 0 }
  0x11   : > { %s1270_s25 = scalar_select %p1009_p12, 1, 0 }
  0x12   : > { %s721_s27 = sshll.u32 %s922_s15, 11  ;;  %s673_s28 = sshll.u32 %s137_s26, 7 }
  0x13   : > { %s1018_s4 = scalar_lea.hbm %s1261_s0, %s721_s27  ;;  %s141_s5 = scalar_lea.vmem [#allocation2], %s673_s28 }
  0x14   : > { %s149_s6 = sshll.u32 %s141_s5, 4  ;;  %p1022_p13 = pnand %p765_p10, %p994_p5  ;;  %s1026_s6 = int_to_ptr.vmem [resolvable:$true] %s149_s6 }
  0x15   : > { %s1028_s8 = scalar_lea.sflag [#allocation3], %s137_s26  ;;  %s830_s9 = scalar_lea.hbm %s1018_s4, 2048 }
  0x16   : > { %p831_p0 = scmp.ne.s32.totalorder %s1018_s4, %s830_s9  ;;  %p832_p1 = pneg %p1022_p13 }
  0x17   : > { %s835_s17 = scalar_lea.hbm %s1261_s0, 4096  ;;  %p836_p4 = scmp.lt.s32.totalorder %s1018_s4, %s1261_s0 }
  0x18   : > { %p833_p2 = pnand %p832_p1, %p831_p0  ;;  %p837_p5 = scmp.lt.s32.totalorder %s835_s17, %s830_s9 }
  0x1a   : > { %p834_p3 = pneg %p833_p2  ;;  %p838_p7 = por %p837_p5, %p836_p4 }
  0x1c   : > { %p839_p8 = pnand %p838_p7, %p834_p3 }
  0x1e   : > { %842 = shalt.err (!%p839_p8)
}
  0x1f   : > { %s843_s22 = scalar_lea.vmem %s1026_s6, 2048  ;;  %s924_s26 = smov [#allocation2]  }
  0x20   : > { %p844_p10 = scmp.ne.s32.totalorder %s1026_s6, %s843_s22  ;;  %s848_s27 = sshll.u32 %s924_s26, 4  ;;  %s849_s27 = int_to_ptr.vmem [resolvable:$false] %s848_s27 }
  0x21   : > { %s850_s28 = scalar_lea.vmem %s849_s27, 4096  ;;  %p851_p2 = scmp.lt.s32.totalorder %s1026_s6, %s849_s27 }
  0x22   : > { %p846_p9 = pnand %p844_p10, %p832_p1  ;;  %p852_p12 = scmp.lt.s32.totalorder %s850_s28, %s843_s22 }
  0x24   : > { %p847_p0 = pneg %p846_p9  ;;  %p853_p11 = por %p852_p12, %p851_p2 }
  0x26   : > { %p854_p6 = pnand %p853_p11, %p847_p0 }
  0x28   : > { %857 = shalt.err (!%p854_p6)
}
  0x29   : > { %s925_s29 = smov 256   ;;  %s926_s30 = smov 16  }
  0x2a   : > { %760 = dma.hbm_to_vmem [thread:$0]  (!%p1022_p13), %s1018_s4, 2048, %s1026_s6, %s1028_s8, %s925_s29, %s925_s29, %s926_s30  }
  0x2b   : > { %p677_p9 = scmp.ge.s32.totalorder %s922_s15, 1  ;;  %p157_p1 = scmp.lt.s32.totalorder %s922_s15, 3 }
  0x2d   : > { %p158_p3 = pnand %p677_p9, %p157_p1 }
  0x2e   : > { %s1052_s5 = sand.u32 (!%p158_p3), 1, %s914_s13   ;;  %p1272_p6 = scmp.ne.s32.totalorder (!%p158_p3), %s1268_s23, 0 }
  0x2f   : > { %161 = sbr.rel (%p158_p3) target bundleno = 923 (0x39b), region = 32  ;;  %s678_s9 = sshll.u32 (!%p158_p3), %s1052_s5, 7 }
  0x30   : > { %s164_s10 = scalar_lea.sflag (!%p158_p3), [#allocation3], %s1052_s5  ;;  %s1058_s11 = scalar_lea.vmem (!%p158_p3), [#allocation2], %s678_s9 }
  0x34   : > { %901 = dma.done.wait (%p1272_p6), %s164_s10, 2048  }
  0x35   : > { %903 = vsyncadd (%p1272_p6), %s164_s10, 4294965248  ;;  %v1065_v0 = vld [vmem:[%s1058_s11 + $0x30] sm:$0xff]  ;;  %v1068_v1 = vld [vmem:[%s1058_s11 + $0x38] sm:$0xff]  ;;  %v927_v30 = vmov 0.0   ;;  %vm928_vm0 = vmmov 0   ;;  %vm265_vm1 = vcmask 7168  }
  0x36   : > { %v1071_v2 = vld [vmem:[%s1058_s11 + $0x20] sm:$0xff]  ;;  %v209_v3 = vadd.f32 %v1068_v1, %v1065_v0  ;;  %v1076_v4 = vld [vmem:[%s1058_s11 + $0x28] sm:$0xff]  ;;  %v1079_v5 = vld [vmem:[%s1058_s11 + $0x70] sm:$0xff]  ;;  %v225_v14 = vmax.f32 %v1065_v0, %v1068_v1  ;;  %734 = vmatprep.subr.mxu0 %v927_v30  ;;  %742 = vmatprep.mubr.msk.f32.mxu0 %vm928_vm0, %v927_v30  ;;  %vm270_vm2 = vcmask 15360   ;;  %vm275_vm3 = vcmask 23552   ;;  %s929_s27 = smov 126  }
  0x37   : > { %v1082_v6 = vld [vmem:[%s1058_s11 + $0x78] sm:$0xff]  ;;  %v206_v7 = vadd.f32 %v1076_v4, %v1071_v2  ;;  %v1087_v8 = vld [vmem:[%s1058_s11 + $0x60] sm:$0xff]  ;;  %v1090_v9 = vld [vmem:[%s1058_s11 + $0x68] sm:$0xff]  ;;  %v222_v22 = vmax.f32 %v1071_v2, %v1076_v4  ;;  %vm281_vm4 = vcmask 261120   ;;  %vm372_vm5 = vcmask 1041408   ;;  %s1179_s28 = scalar_lea.vmem [#allocation5], %s678_s9 }
  0x38   : > { %210 = vadd.xlane.f32.xlu0 %v209_v3  ;;  %v246_v10 = vadd.f32 %v1082_v6, %v1079_v5  ;;  %v243_v11 = vadd.f32 %v1090_v9, %v1087_v8  ;;  %v1097_v12 = vld [vmem:[%s1058_s11 + $0x10] sm:$0xff]  ;;  %v1100_v13 = vld [vmem:[%s1058_s11 + $0x18] sm:$0xff]  ;;  %v262_v19 = vmax.f32 %v1079_v5, %v1082_v6  ;;  %v1117_v20 = vld [vmem:[%s1058_s11] sm:$0xff]  ;;  %v259_v27 = vmax.f32 %v1087_v8, %v1090_v9  ;;  %s723_s29 = sshll.u32 %s976_s16, 11  ;;  %s597_s30 = sshll.u32 %s1179_s28, 4  ;;  %s1214_s30 = int_to_ptr.vmem [resolvable:$true] %s597_s30 }
  0x39   : > { %207 = vadd.xlane.f32.xlu1 %v206_v7  ;;  %v203_v15 = vadd.f32 %v1100_v13, %v1097_v12  ;;  %v1107_v16 = vld [vmem:[%s1058_s11 + $0x50] sm:$0xff]  ;;  %v1110_v17 = vld [vmem:[%s1058_s11 + $0x58] sm:$0xff]  ;;  %v1120_v21 = vld [vmem:[%s1058_s11 + $0x8] sm:$0xff]  ;;  %v219_v28 = vmax.f32 %v1097_v12, %v1100_v13  ;;  %s583_s16 = scalar_lea.sflag [#allocation4], %s1052_s5  ;;  %s858_s23 = scalar_lea.vmem %s1214_s30, 2048 }
  0x3a   : > { %v240_v18 = vadd.f32 %v1110_v17, %v1107_v16  ;;  %v200_v23 = vadd.f32 %v1120_v21, %v1117_v20  ;;  %v1127_v24 = vld [vmem:[%s1058_s11 + $0x40] sm:$0xff]  ;;  %v1130_v25 = vld [vmem:[%s1058_s11 + $0x48] sm:$0xff]  ;;  %v256_v29 = vmax.f32 %v1107_v16, %v1110_v17  ;;  %v216_v31 = vmax.f32 %v1117_v20, %v1120_v21  ;;  %s1212_s11 = scalar_lea.hbm %s1264_s3, %s723_s29  ;;  %p859_p11 = scmp.ne.s32.totalorder %s1214_s30, %s858_s23 }
  0x3b   : > { %v237_v26 = vadd.f32 %v1130_v25, %v1127_v24  ;;  %v253_v32 = vmax.f32 %v1127_v24, %v1130_v25  ;;  %p1273_p12 = scmp.ne.s32.totalorder %s1269_s24, 0  ;;  %s932_s4 = smov [#allocation5]  }
  0x3c   : > { %247 = vadd.xlane.f32.xlu0 %v246_v10  ;;  %s862_s6 = sshll.u32 %s932_s4, 4  ;;  %s863_s6 = int_to_ptr.vmem [resolvable:$false] %s862_s6 }
  0x3d   : > { %244 = vadd.xlane.f32.xlu1 %v243_v11  ;;  %p860_p13 = pnand %p859_p11, %p1273_p12  ;;  %s864_s7 = scalar_lea.vmem %s863_s6, 4096 }
  0x3e   : > { %p865_p5 = scmp.lt.s32.totalorder %s1214_s30, %s863_s6  ;;  %p866_p7 = scmp.lt.s32.totalorder %s864_s7, %s858_s23 }
  0x3f   : > { %p861_p4 = pneg %p860_p13 }
  0x40   : > { %226 = vmax.xlane.f32.xlu0 %v225_v14  ;;  %v280_v14 = vld [vmem:[%s1262_s1] sm:$0x3]  ;;  %p867_p8 = por %p866_p7, %p865_p5 }
  0x41   : > { %204 = vadd.xlane.f32.xlu1 %v203_v15 }
  0x42   : > { %p868_p10 = pnand %p867_p8, %p861_p4 }
  0x44   : > { %241 = vadd.xlane.f32.xlu0 %v240_v18  ;;  %v356_v18 = vld [vmem:[%s1263_s2] sm:$0xff] }
  0x45   : > { %263 = vmax.xlane.f32.xlu1 %v262_v19  ;;  %747 = vmatprep.mubr.msk.f32.mxu1 %vm270_vm2, %v356_v18 }
  0x48   : > { %223 = vmax.xlane.f32.xlu0 %v222_v22 }
  0x49   : > { %201 = vadd.xlane.f32.xlu1 %v200_v23 }
  0x4c   : > { %238 = vadd.xlane.f32.xlu0 %v237_v26  ;;  %v357_v26 = vld [vmem:[%s1263_s2 + $0x8] sm:$0xff] }
  0x4d   : > { %260 = vmax.xlane.f32.xlu1 %v259_v27  ;;  %v358_v27 = vld [vmem:[%s1263_s2 + $0x10] sm:$0xff] }
  0x50   : > { %220 = vmax.xlane.f32.xlu0 %v219_v28  ;;  %v359_v28 = vld [vmem:[%s1263_s2 + $0x18] sm:$0xff] }
  0x51   : > { %257 = vmax.xlane.f32.xlu1 %v256_v29 }
  0x54   : > { %217 = vmax.xlane.f32.xlu0 %v216_v31 }
  0x55   : > { %254 = vmax.xlane.f32.xlu1 %v253_v32 }
  0xc1   : > { %v211_v33 = vpop.xlane.xlu0 %210 }
  0xc2   : > { %v208_v34 = vpop.xlane.xlu1 %207  ;;  %v215_v38 = vmul.f32 0.00390625, %v211_v33  ;;  %v930_v33 = vmov 0  }
  0xc3   : > { %v214_v49 = vmul.f32 0.00390625, %v208_v34  ;;  %808 = vset.pattern.permute.xlu1 %v930_v33  ;;  %809 = vset.pattern.permute.xlu0 %v930_v33 }
  0xc5   : > { %v248_v35 = vpop.xlane.xlu0 %247 }
  0xc6   : > { %v245_v36 = vpop.xlane.xlu1 %244  ;;  %v252_v37 = vmul.f32 0.00390625, %v248_v35 }
  0xc7   : > { %v251_v46 = vmul.f32 0.00390625, %v245_v36 }
  0xc8   : > { %v269_v41 = vsel %vm265_vm1, %v215_v38, %v252_v37 }
  0xc9   : > { %v227_v39 = vpop.xlane.xlu0 %226  ;;  %v268_v51 = vsel %vm265_vm1, %v214_v49, %v251_v46 }
  0xca   : > { %v205_v40 = vpop.xlane.xlu1 %204  ;;  %v274_v43 = vsel %vm270_vm2, %v269_v41, %v227_v39 }
  0xcb   : > { %v213_v55 = vmul.f32 0.00390625, %v205_v40 }
  0xcd   : > { %v242_v42 = vpop.xlane.xlu0 %241 }
  0xce   : > { %v264_v44 = vpop.xlane.xlu1 %263  ;;  %v250_v50 = vmul.f32 0.00390625, %v242_v42 }
  0xcf   : > { %v279_v45 = vsel %vm275_vm3, %v274_v43, %v264_v44 }
  0xd0   : > { %735 = vmatpush3.msra.mxu0 %v279_v45  ;;  %v267_v59 = vsel %vm265_vm1, %v213_v55, %v250_v50 }
  0xd1   : > { %v224_v47 = vpop.xlane.xlu0 %223  ;;  %736 = vmatprep.subr.mxu0 %v927_v30 }
  0xd2   : > { %v202_v48 = vpop.xlane.xlu1 %201  ;;  %v273_v53 = vsel %vm270_vm2, %v268_v51, %v224_v47 }
  0xd3   : > { %v212_v62 = vmul.f32 0.00390625, %v202_v48 }
  0xd5   : > { %v239_v52 = vpop.xlane.xlu0 %238 }
  0xd6   : > { %v261_v54 = vpop.xlane.xlu1 %260  ;;  %v249_v57 = vmul.f32 0.00390625, %v239_v52 }
  0xd7   : > { %v278_v56 = vsel %vm275_vm3, %v273_v53, %v261_v54 }
  0xd8   : > { %737 = vmatpush3.msra.mxu0 %v278_v56  ;;  %v266_v7 = vsel %vm265_vm1, %v212_v62, %v249_v57  ;;  %v931_v56 = vmov 1  }
  0xd9   : > { %v221_v58 = vpop.xlane.xlu0 %220  ;;  %738 = vmatprep.subr.mxu0 %v927_v30 }
  0xda   : > { %v272_v60 = vsel %vm270_vm2, %v267_v59, %v221_v58  ;;  %v258_v61 = vpop.xlane.xlu1 %257 }
  0xdb   : > { %v277_v63 = vsel %vm275_vm3, %v272_v60, %v258_v61 }
  0xdc   : > { %739 = vmatpush3.msra.mxu0 %v277_v63 }
  0xdd   : > { %v218_v3 = vpop.xlane.xlu0 %217  ;;  %740 = vmatprep.subr.mxu0 %v927_v30 }
  0xde   : > { %v271_v10 = vsel %vm270_vm2, %v266_v7, %v218_v3  ;;  %v255_v11 = vpop.xlane.xlu1 %254 }
  0xdf   : > { %v276_v15 = vsel %vm275_vm3, %v271_v10, %v255_v11 }
  0xe0   : > { %741 = vmatpush3.msra.mxu0 %v276_v15 }
  0xe1   : > { %743 = vmatmul.mubr.msk.f32.vlgmr.msra.gmra.mxu0 %vm281_vm4, %v280_v14 }
 0x1a1   : > { %v351_v19 = vpop.f32.mrf.mxu0 }
 0x1a2   : > { %v355_v22 = vmax.f32 %v351_v19, 0.0 }
 0x1a3   : > { %v744_v23 = vpop.f32.mrf.mxu0 }
 0x1a4   : > { %745 = vmatprep.subr.msk.mxu1 %vm372_vm5, %v355_v22 }
 0x1a5   : > { %746 = vmatpush3.msk.msra.mxu1 %vm372_vm5, %v355_v22 }
 0x1a6   : > { %748 = vmatmul.mubr.msk.f32.vlgmr.msra.gmra.mxu1 %vm270_vm2, %v357_v26 }
 0x1a7   : > { %750 = vmatprep.mubr.msk.f32.mxu1 %vm270_vm2, %v358_v27 }
 0x1aa   : > { %751 = vmatmul.mubr.msk.f32.gmra.mxu1 %vm270_vm2, %v359_v28 }
 0x266   : > { %v749_v29 = vpop.f32.mrf.mxu1 }
 0x267   : > { %467 = vrot.lane.b32.xlu1 %v749_v29, %s929_s27 }
 0x268   : > { %v442_v30 = vpop.f32.mrf.mxu1 }
 0x269   : > { %465 = vrot.lane.b32.xlu0 %v442_v30, %s929_s27 }
 0x26a   : > { %v752_v31 = vpop.f32.mrf.mxu1 }
 0x26c   : > { %v452_v32 = vpop.f32.mrf.mxu1 }
 0x26d   : > { %469 = vrot.lane.b32.xlu1 %v452_v32, %s929_s27 }
 0x271   : > { %471 = vrot.lane.b32.xlu1 %v752_v31, %s929_s27 }
 0x2d9   : > { %v468_v34 = vpop.permute.xlu1 %467 }
 0x2da   : > { %v478_v35 = vadd.f32 %v749_v29, %v468_v34 }
 0x2db   : > { %v466_v36 = vpop.permute.xlu0 %465 }
 0x2dc   : > { %v695_v37 = vmul.f32 -1.442695, %v478_v35  ;;  %v477_v38 = vadd.f32 %v466_v36, %v442_v30 }
 0x2de   : > { %814 = vpow2.f32 %v695_v37  ;;  %v694_v39 = vmul.f32 -1.442695, %v477_v38 }
 0x2df   : > { %v470_v40 = vpop.permute.xlu1 %469 }
 0x2e0   : > { %816 = vpow2.f32 %v694_v39  ;;  %v479_v41 = vadd.f32 %v470_v40, %v452_v32 }
 0x2e2   : > { %v696_v42 = vmul.f32 -1.442695, %v479_v41 }
 0x2e3   : > { %v472_v43 = vpop.permute.xlu1 %471 }
 0x2e4   : > { %818 = vpow2.f32 %v696_v42  ;;  %v480_v44 = vadd.f32 %v752_v31, %v472_v43 }
 0x2e6   : > { %v697_v45 = vmul.f32 -1.442695, %v480_v44 }
 0x2e8   : > { %820 = vpow2.f32 %v697_v45 }
 0x2eb   : > { %v815_v46 = vpop.eup %814 }
 0x2ec   : > { %v494_v47 = vadd.f32 1.0, %v815_v46 }
 0x2ed   : > { %v817_v48 = vpop.eup %816 }
 0x2ee   : > { %822 = vrcp.f32 %v494_v47  ;;  %v493_v49 = vadd.f32 1.0, %v817_v48 }
 0x2f0   : > { %824 = vrcp.f32 %v493_v49 }
 0x2f1   : > { %v819_v50 = vpop.eup %818 }
 0x2f2   : > { %v495_v51 = vadd.f32 1.0, %v819_v50 }
 0x2f4   : > { %826 = vrcp.f32 %v495_v51 }
 0x2f5   : > { %v821_v52 = vpop.eup %820 }
 0x2f6   : > { %v496_v53 = vadd.f32 1.0, %v821_v52 }
 0x2f8   : > { %828 = vrcp.f32 %v496_v53 }
 0x2fb   : > { %v823_v54 = vpop.eup %822 }
 0x2fc   : > { %512 = vperm.xlu1 %808, %v823_v54  }
 0x2fd   : > { %v825_v55 = vpop.eup %824 }
 0x2fe   : > { %507 = vperm.xlu0 %809, %v825_v55  }
 0x300   : > { %810 = vset.pattern.permute.xlu1 %v931_v56 }
 0x301   : > { %550 = vperm.xlu1 %810, %v825_v55   ;;  %v827_v57 = vpop.eup %826 }
 0x305   : > { %v829_v58 = vpop.eup %828  ;;  %811 = vset.pattern.permute.xlu1 %v930_v33 }
 0x306   : > { %517 = vperm.xlu1 %811, %v827_v57   ;;  %522 = vperm.xlu0 %809, %v829_v58  }
 0x30a   : > { %813 = vset.pattern.permute.xlu1 %v931_v56  ;;  %812 = vset.pattern.permute.xlu0 %v931_v56 }
 0x30b   : > { %558 = vperm.xlu1 %813, %v827_v57   ;;  %554 = vperm.xlu0 %812, %v823_v54  }
 0x30f   : > { %562 = vperm.xlu1 %813, %v829_v58  }
 0x377   : > { %v513_v59 = vpop.permute.xlu1 %512 }
 0x378   : > { %v527_v60 = vmul.f32 %v513_v59, %v1097_v12  ;;  %v528_v61 = vmul.f32 %v513_v59, %v1100_v13 }
 0x379   : > { %v508_v62 = vpop.permute.xlu0 %507 }
 0x37a   : > { %535 = vst [vmem:[%s1179_s28 + $0x10] sm:$0xff] %v527_v60  ;;  %536 = vst [vmem:[%s1179_s28 + $0x18] sm:$0xff] %v528_v61  ;;  %v525_v63 = vmul.f32 %v508_v62, %v1117_v20  ;;  %v526_v12 = vmul.f32 %v508_v62, %v1120_v21 }
 0x37c   : > { %533 = vst [vmem:[%s1179_s28] sm:$0xff] %v525_v63  ;;  %534 = vst [vmem:[%s1179_s28 + $0x8] sm:$0xff] %v526_v12  ;;  %v551_v13 = vpop.permute.xlu1 %550 }
 0x37d   : > { %v565_v3 = vmul.f32 %v1127_v24, %v551_v13  ;;  %v566_v7 = vmul.f32 %v1130_v25, %v551_v13 }
 0x37f   : > { %706 = vst [vmem:[%s1179_s28 + $0x40] sm:$0xff] %v565_v3  ;;  %707 = vst [vmem:[%s1179_s28 + $0x48] sm:$0xff] %v566_v7 }
 0x381   : > { %v523_v10 = vpop.permute.xlu0 %522  ;;  %v518_v11 = vpop.permute.xlu1 %517 }
 0x382   : > { %v531_v20 = vmul.f32 %v523_v10, %v1065_v0  ;;  %v532_v21 = vmul.f32 %v523_v10, %v1068_v1  ;;  %v529_v14 = vmul.f32 %v518_v11, %v1071_v2  ;;  %v530_v15 = vmul.f32 %v518_v11, %v1076_v4 }
 0x384   : > { %539 = vst [vmem:[%s1179_s28 + $0x30] sm:$0xff] %v531_v20  ;;  %540 = vst [vmem:[%s1179_s28 + $0x38] sm:$0xff] %v532_v21 }
 0x385   : > { %537 = vst [vmem:[%s1179_s28 + $0x20] sm:$0xff] %v529_v14  ;;  %538 = vst [vmem:[%s1179_s28 + $0x28] sm:$0xff] %v530_v15 }
 0x386   : > { %v555_v24 = vpop.permute.xlu0 %554  ;;  %v559_v25 = vpop.permute.xlu1 %558 }
 0x387   : > { %v567_v18 = vmul.f32 %v1107_v16, %v555_v24  ;;  %v568_v0 = vmul.f32 %v1110_v17, %v555_v24  ;;  %v569_v1 = vmul.f32 %v1087_v8, %v559_v25  ;;  %v570_v2 = vmul.f32 %v1090_v9, %v559_v25 }
 0x389   : > { %708 = vst [vmem:[%s1179_s28 + $0x50] sm:$0xff] %v567_v18  ;;  %709 = vst [vmem:[%s1179_s28 + $0x58] sm:$0xff] %v568_v0 }
 0x38a   : > { %710 = vst [vmem:[%s1179_s28 + $0x60] sm:$0xff] %v569_v1  ;;  %711 = vst [vmem:[%s1179_s28 + $0x68] sm:$0xff] %v570_v2  ;;  %v563_v4 = vpop.permute.xlu1 %562 }
 0x38b   : > { %v571_v8 = vmul.f32 %v1079_v5, %v563_v4  ;;  %v572_v9 = vmul.f32 %v1082_v6, %v563_v4 }
 0x38d   : > { %712 = vst [vmem:[%s1179_s28 + $0x70] sm:$0xff] %v571_v8  ;;  %713 = vst [vmem:[%s1179_s28 + $0x78] sm:$0xff] %v572_v9 }
 0x38e   : > { %871 = shalt.err (!%p868_p10)
}
 0x38f   : > { %s872_s8 = scalar_lea.hbm %s1212_s11, 2048  ;;  %s876_s20 = scalar_lea.hbm %s1264_s3, 4096 }
 0x390   : > { %p873_p0 = scmp.ne.s32.totalorder %s1212_s11, %s872_s8  ;;  %p877_p1 = scmp.lt.s32.totalorder %s1212_s11, %s1264_s3 }
 0x391   : > { %p878_p3 = scmp.lt.s32.totalorder %s876_s20, %s872_s8 }
 0x392   : > { %p874_p2 = pnand %p873_p0, %p1273_p12 }
 0x393   : > { %p879_p6 = por %p878_p3, %p877_p1 }
 0x394   : > { %p875_p9 = pneg %p874_p2 }
 0x396   : > { %p880_p11 = pnand %p879_p6, %p875_p9 }
 0x398   : > { %883 = shalt.err (!%p880_p11)
}
 0x399   : > { %s933_s27 = smov 256   ;;  %s934_s28 = smov 16  }
 0x39a   : > { %755 = dma.vmem_to_hbm [thread:$0]  (%p1273_p12), %s1214_s30, 2048, %s1212_s11, %s583_s16, %s933_s27, %s933_s27, %s934_s28  }
 0x39b PF: > { %s612_s29 = sand.u32 1, %s910_s12   ;;  %p1274_p13 = scmp.ne.s32.totalorder %s1270_s25, 0 }
 0x39c   : > { %p1275_p4 = scmp.ge.s32.totalorder %s922_s15, 2  ;;  %s613_s9 = scalar_lea.sflag [#allocation4], %s612_s29 }
 0x39e   : > { %p762_p5 = pnand %p1275_p4, %p1274_p13 }
 0x3a0   : > { %p763_p7 = pneg %p762_p5 }
 0x3a2   : > { %905 = dma.done.wait (%p763_p7), %s613_s9, 2048  }
 0x3a3   : > { %907 = vsyncadd (%p763_p7), %s613_s9, 4294965248  ;;  %p16_p8 = scmp.ge.s32.totalorder %s980_s18, 4   ;;  %s1276_s12 = smov %s914_s13 }
 0x3a4   : > { %s1277_s13 = smov %s918_s14  ;;  %s1278_s14 = smov %s992_s21 }
 0x3a5   : > { %s1279_s15 = smov %s980_s18  ;;  %18 = sbr.rel (!%p16_p8) target bundleno = 5 (0x5), region = 79 }
 0x3aa   :  { %618 = vsyncpa [#allocation3], 1 }
 0x3ab   :  { %620 = vsyncpa [#allocation3 + $0x1], 1 }
 0x3ac   :  { %621 = vsyncpa [#allocation4], 1 }
 0x3ad   :  { %623 = vsyncpa [#allocation4 + $0x1], 1 }

</bundles_post_ra>
